<compile_context>
chip_gen: v5e
topology: v5e:2x2
jax: 0.10.0
libtpu: 0.0.40
codegen_flags: <defaults>
</compile_context>

<pallas_src>
import functools

import jax
import jax.numpy as jnp
from jax.experimental import pallas as pl
from jax.experimental.pallas import tpu as pltpu


def _lstm_net_kernel(xin_ref, slab_ref, out_ref, xg_ref, *, T, B, D, H, OUT):
    # ---- unpack the single parameter slab (weights rows 0:D, biases in row D) ----
    slab = slab_ref[...]                              # (D+1, 2D + 8H + OUT)
    W = slab[0:D, :]
    brow = slab[D:D + 1, :]

    w1 = W[:, 0:D]                                    # lin1            (D, D)
    wih = W[:, D:D + 4 * H]                           # LSTM W_ih^T     (D, 4H)  gate order i,f,o,g
    whh = W[:, D + 4 * H:D + 8 * H]                   # LSTM W_hh^T     (H, 4H)  gate order i,f,o,g
    w2 = W[:, D + 8 * H:2 * D + 8 * H]                # lin2            (H, D)
    w3 = W[:, 2 * D + 8 * H:2 * D + 8 * H + OUT]      # lin3            (D, OUT)

    b1 = brow[:, 0:D]
    bg = brow[:, D:D + 4 * H]                         # b_ih + b_hh (pre-folded, reordered)
    b2 = brow[:, D + 4 * H:2 * D + 4 * H]
    b3 = brow[:, 2 * D + 4 * H:2 * D + 4 * H + OUT]

    # ---- lin1 + ReLU over all timesteps at once (batch-first rows: r = b*T + t) ----
    x = xin_ref[0:B * T, :]                           # (B*T, D)
    pre = jnp.maximum(
        jnp.dot(x, w1, preferred_element_type=jnp.float32) + b1, 0.0)

    # ---- hoisted input->hidden gates for ALL timesteps, stored to VMEM scratch ----
    xg_ref[...] = jnp.dot(pre, wih, preferred_element_type=jnp.float32) + bg   # (B*T, 4H)

    # ---- initial hidden/cell state: trailing rows of the activation slab ----
    h = xin_ref[B * T:B * T + B, :]                   # (B, H)
    c = xin_ref[B * T + B:B * T + 2 * B, :]           # (B, H)

    # ---- LSTM recurrence, fully unrolled; gate columns are (i, f, o, g) ----
    hs_list = []
    for t in range(T):
        # batch-first rows for step t are {b*T + t}: documented strided sublane load.
        xg_t = xg_ref[pl.ds(t, B, stride=T), :]                       # (B, 4H)
        gates = xg_t + jnp.dot(h, whh, preferred_element_type=jnp.float32)
        sio = jax.nn.sigmoid(gates[:, 0:3 * H])       # sigmoid only over i,f,o lanes
        g = jnp.tanh(gates[:, 3 * H:4 * H])           # tanh only over g lanes
        i = sio[:, 0:H]
        f = sio[:, H:2 * H]
        o = sio[:, 2 * H:3 * H]
        c = f * c + i * g
        h = o * jnp.tanh(c)
        hs_list.append(h)

    # ---- final hidden/cell state into the trailing rows of the single output slab ----
    out_ref[B * T:B * T + B, 0:H] = h
    out_ref[B * T:B * T + B, H:2 * H] = c

    # ---- ReLU -> lin2 -> ReLU -> lin3 -> softmax over all timesteps at once ----
    # (B, T, H) -> (B*T, H) is a metadata-only reshape here (T == sublane tile of 8),
    # producing batch-first rows that match the probs output layout directly.
    hs = jnp.reshape(jnp.stack(hs_list, axis=1), (B * T, H))
    hs = jnp.maximum(hs, 0.0)
    z = jnp.maximum(
        jnp.dot(hs, w2, preferred_element_type=jnp.float32) + b2, 0.0)
    logits = jnp.dot(z, w3, preferred_element_type=jnp.float32) + b3
    m = jnp.max(logits, axis=-1, keepdims=True)
    e = jnp.exp(logits - m)
    inv = pl.reciprocal(jnp.sum(e, axis=-1, keepdims=True))            # exact; EUP slot
    out_ref[0:B * T, 0:OUT] = e * inv                                  # (B*T, OUT), batch-first


def prepare_params(params):
    """One-time packing of all weights/biases into a single (D+1, 2D+8H+OUT) f32 slab.

    Gate blocks are reordered from PyTorch (i, f, g, o) to (i, f, o, g) so the kernel applies
    sigmoid to lanes 0:3H and tanh to lanes 3H:4H only. b_ih + b_hh is folded.
    """
    D = params["w1"].shape[0]
    H = params["w_hh"].shape[1]
    OUT = params["w3"].shape[0]
    assert H == D, "packing assumes hidden_dim == input_dim (as in BaselineLSTMNet)"

    def reorder(m, axis):  # i,f,g,o -> i,f,o,g along `axis`
        blk = jnp.split(m, 4, axis=axis)
        return jnp.concatenate([blk[0], blk[1], blk[3], blk[2]], axis=axis)

    wih_t = reorder(params["w_ih"].T, axis=1)          # (D, 4H)
    whh_t = reorder(params["w_hh"].T, axis=1)          # (H, 4H)
    bg = reorder(params["b_ih"] + params["b_hh"], axis=0)

    w_rows = jnp.concatenate(
        [params["w1"].T, wih_t, whh_t, params["w2"].T, params["w3"].T],
        axis=1).astype(jnp.float32)                    # (D, 2D+8H+OUT)
    b_vec = jnp.concatenate([params["b1"], bg, params["b2"], params["b3"]]).astype(jnp.float32)
    b_row = jnp.pad(b_vec, (0, w_rows.shape[1] - b_vec.shape[0]))[None, :]
    return jnp.concatenate([w_rows, b_row], axis=0)    # (D+1, 2D+8H+OUT)


@jax.jit
def baseline_lstm_net_forward(x, hidden, slab):
    """x: (B, T, D) f32; hidden: ((1, B, H), (1, B, H)); slab from prepare_params().

    Returns (softmax probs (B, T, OUT), (h_n, c_n)) matching the PyTorch module.
    """
    h0, c0 = hidden
    B, T, D = x.shape
    H = D
    assert h0.shape == (1, B, H) and c0.shape == (1, B, H), \
        "hidden state must be (num_layers=1, B, H) with H == input_dim"
    OUT = slab.shape[1] - 2 * D - 8 * H
    assert slab.shape == (D + 1, 2 * D + 8 * H + OUT)
    OW = max(OUT, 2 * H)

    # One activation slab: x (batch-first, plain reshape — no transpose) + h0 + c0 rows.
    xin = jnp.concatenate([x.reshape(B * T, D), h0[0], c0[0]], axis=0)  # (B*T + 2B, D)

    kern = functools.partial(_lstm_net_kernel, T=T, B=B, D=D, H=H, OUT=OUT)
    vmem = pl.BlockSpec(memory_space=pltpu.MemorySpace.VMEM)
    out = pl.pallas_call(
        kern,
        out_shape=jax.ShapeDtypeStruct((B * T + B, OW), jnp.float32),
        in_specs=[vmem, vmem],
        out_specs=vmem,
        scratch_shapes=[pltpu.VMEM((B * T, 4 * H), jnp.float32)],
    )(xin, slab)

    probs = out[0:B * T, 0:OUT].reshape(B, T, OUT)      # already batch-first: reshape only
    hn = out[B * T:B * T + B, 0:H][None]                 # (1, B, H)
    cn = out[B * T:B * T + B, H:2 * H][None]             # (1, B, H)
    return probs, (hn, cn)


def init_params(key, input_dim, output_dim):
    D, H, OUT = input_dim, input_dim, output_dim
    ks = jax.random.split(key, 10)

    def u(k, shape, fan_in):
        bound = 1.0 / jnp.sqrt(jnp.float32(fan_in))
        return jax.random.uniform(k, shape, jnp.float32, -bound, bound)

    return dict(
        w1=u(ks[0], (D, D), D),       b1=u(ks[1], (D,), D),
        w_ih=u(ks[2], (4 * H, D), H), b_ih=u(ks[3], (4 * H,), H),
        w_hh=u(ks[4], (4 * H, H), H), b_hh=u(ks[5], (4 * H,), H),
        w2=u(ks[6], (D, H), H),       b2=u(ks[7], (D,), H),
        w3=u(ks[8], (OUT, D), D),     b3=u(ks[9], (OUT,), D),
    )


def reference_forward(x, hidden, p):
    """Pure-JAX reference replicating the PyTorch forward (gate order i, f, g, o)."""
    h = hidden[0][0]
    c = hidden[1][0]
    B, T, D = x.shape
    pre = jnp.maximum(x @ p["w1"].T + p["b1"], 0.0)
    outs = []
    for t in range(T):
        xt = pre[:, t, :]
        gates = xt @ p["w_ih"].T + p["b_ih"] + h @ p["w_hh"].T + p["b_hh"]
        i, f, g, o = jnp.split(gates, 4, axis=-1)
        i, f, g, o = jax.nn.sigmoid(i), jax.nn.sigmoid(f), jnp.tanh(g), jax.nn.sigmoid(o)
        c = f * c + i * g
        h = o * jnp.tanh(c)
        outs.append(h)
    hs = jnp.stack(outs, axis=1)                                      # (B, T, H)
    z = jnp.maximum(jnp.maximum(hs, 0.0) @ p["w2"].T + p["b2"], 0.0)
    logits = z @ p["w3"].T + p["b3"]
    return jax.nn.softmax(logits, axis=2), (h[None], c[None])


if __name__ == "__main__":
    key = jax.random.PRNGKey(0)
    input_dim, output_dim = 8, 8        # input_dim <= 10 -> plain Linear lin1 branch
    B, T = 2, 8

    kp, kx = jax.random.split(key)
    params = init_params(kp, input_dim, output_dim)
    slab = prepare_params(params)       # one-time packing, hoisted out of the forward path

    x = jax.random.normal(kx, (B, T, input_dim), jnp.float32)
    h0 = jnp.zeros((1, B, input_dim), jnp.float32)   # init_hidden(batch_size=B)
    c0 = jnp.zeros((1, B, input_dim), jnp.float32)

    probs, (hn, cn) = baseline_lstm_net_forward(x, (h0, c0), slab)
    jax.block_until_ready((probs, hn, cn))

    ref_probs, (ref_hn, ref_cn) = reference_forward(x, (h0, c0), params)
    assert jnp.allclose(probs, ref_probs, atol=1e-5), "probs mismatch"
    assert jnp.allclose(hn, ref_hn, atol=1e-5), "h_n mismatch"
    assert jnp.allclose(cn, ref_cn, atol=1e-5), "c_n mismatch"

    print("KERNEL_OK")
</pallas_src>

<mosaic_0001>
module attributes {stable_mosaic.version = 11 : i64} {
  func.func @_lstm_net_kernel(%arg0: memref<20x8xf32, #tpu.memory_space<vmem>>, %arg1: memref<9x88xf32, #tpu.memory_space<vmem>>, %arg2: memref<18x16xf32, #tpu.memory_space<vmem>>, %arg3: memref<16x32xf32, #tpu.memory_space<vmem>>) attributes {dimension_semantics = [], scalar_prefetch = 0 : i64, scratch_operands = 1 : i64, tpu.core_type = #tpu.core_type<tc>} {
    %c0 = arith.constant 0 : index
    %c0_0 = arith.constant 0 : index
    %0 = vector.load %arg1[%c0, %c0_0] : memref<9x88xf32, #tpu.memory_space<vmem>>, vector<9x88xf32>
    %1 = vector.extract_strided_slice %0 {offsets = [0, 0], sizes = [8, 88], strides = [1, 1]} : vector<9x88xf32> to vector<8x88xf32>
    %2 = vector.extract_strided_slice %0 {offsets = [8, 0], sizes = [1, 88], strides = [1, 1]} : vector<9x88xf32> to vector<1x88xf32>
    %3 = vector.extract_strided_slice %1 {offsets = [0, 0], sizes = [8, 8], strides = [1, 1]} : vector<8x88xf32> to vector<8x8xf32>
    %4 = vector.extract_strided_slice %1 {offsets = [0, 8], sizes = [8, 32], strides = [1, 1]} : vector<8x88xf32> to vector<8x32xf32>
    %5 = vector.extract_strided_slice %1 {offsets = [0, 40], sizes = [8, 32], strides = [1, 1]} : vector<8x88xf32> to vector<8x32xf32>
    %6 = vector.extract_strided_slice %1 {offsets = [0, 72], sizes = [8, 8], strides = [1, 1]} : vector<8x88xf32> to vector<8x8xf32>
    %7 = vector.extract_strided_slice %1 {offsets = [0, 80], sizes = [8, 8], strides = [1, 1]} : vector<8x88xf32> to vector<8x8xf32>
    %8 = vector.extract_strided_slice %2 {offsets = [0, 0], sizes = [1, 8], strides = [1, 1]} : vector<1x88xf32> to vector<1x8xf32>
    %9 = vector.extract_strided_slice %2 {offsets = [0, 8], sizes = [1, 32], strides = [1, 1]} : vector<1x88xf32> to vector<1x32xf32>
    %10 = vector.extract_strided_slice %2 {offsets = [0, 40], sizes = [1, 8], strides = [1, 1]} : vector<1x88xf32> to vector<1x8xf32>
    %11 = vector.extract_strided_slice %2 {offsets = [0, 48], sizes = [1, 8], strides = [1, 1]} : vector<1x88xf32> to vector<1x8xf32>
    %c0_1 = arith.constant 0 : index
    %c0_2 = arith.constant 0 : index
    %12 = vector.load %arg0[%c0_1, %c0_2] : memref<20x8xf32, #tpu.memory_space<vmem>>, vector<16x8xf32>
    %cst = arith.constant dense<0.000000e+00> : vector<16x8xf32>
    %13 = tpu.matmul %12, %3, %cst {dimension_numbers = #tpu.dot_dimension_numbers<[1], [0], [0], [1], [0, 0, 1, 1], [], []>} : vector<16x8xf32>, vector<8x8xf32>, vector<16x8xf32> -> vector<16x8xf32>
    %14 = vector.broadcast %8 : vector<1x8xf32> to vector<16x8xf32>
    %15 = arith.addf %13, %14 : vector<16x8xf32>
    %cst_3 = arith.constant 0.000000e+00 : f32
    %16 = vector.broadcast %cst_3 : f32 to vector<16x8xf32>
    %17 = arith.maximumf %15, %16 : vector<16x8xf32>
    %cst_4 = arith.constant dense<0.000000e+00> : vector<16x32xf32>
    %18 = tpu.matmul %17, %4, %cst_4 {dimension_numbers = #tpu.dot_dimension_numbers<[1], [0], [0], [1], [0, 0, 1, 1], [], []>} : vector<16x8xf32>, vector<8x32xf32>, vector<16x32xf32> -> vector<16x32xf32>
    %19 = vector.broadcast %9 : vector<1x32xf32> to vector<16x32xf32>
    %20 = arith.addf %18, %19 : vector<16x32xf32>
    %c0_5 = arith.constant 0 : index
    %c0_6 = arith.constant 0 : index
    %21 = vector.load %arg3[%c0_5, %c0_6] : memref<16x32xf32, #tpu.memory_space<vmem>>, vector<16x32xf32>
    tpu.vector_store %arg3[%c0_5, %c0_6], %20 {strides = array<i32>} : memref<16x32xf32, #tpu.memory_space<vmem>>, vector<16x32xf32>,
    %c16 = arith.constant 16 : index
    %c0_7 = arith.constant 0 : index
    %22 = vector.load %arg0[%c16, %c0_7] : memref<20x8xf32, #tpu.memory_space<vmem>>, vector<2x8xf32>
    %c18 = arith.constant 18 : index
    %c0_8 = arith.constant 0 : index
    %23 = vector.load %arg0[%c18, %c0_8] : memref<20x8xf32, #tpu.memory_space<vmem>>, vector<2x8xf32>
    %c0_9 = arith.constant 0 : index
    %c0_10 = arith.constant 0 : index
    %24 = tpu.strided_load %arg3[%c0_9, %c0_10] {strides = array<i32: 8, 1>} : memref<16x32xf32, #tpu.memory_space<vmem>>, vector<2x32xf32>
    %cst_11 = arith.constant dense<0.000000e+00> : vector<2x32xf32>
    %25 = tpu.matmul %22, %5, %cst_11 {dimension_numbers = #tpu.dot_dimension_numbers<[1], [0], [0], [1], [0, 0, 1, 1], [], []>} : vector<2x8xf32>, vector<8x32xf32>, vector<2x32xf32> -> vector<2x32xf32>
    %26 = arith.addf %24, %25 : vector<2x32xf32>
    %27 = vector.extract_strided_slice %26 {offsets = [0, 0], sizes = [2, 24], strides = [1, 1]} : vector<2x32xf32> to vector<2x24xf32>
    %28 = arith.negf %27 : vector<2x24xf32>
    %29 = math.exp %28 : vector<2x24xf32>
    %cst_12 = arith.constant 1.000000e+00 : f32
    %30 = vector.broadcast %cst_12 : f32 to vector<2x24xf32>
    %31 = arith.addf %30, %29 : vector<2x24xf32>
    %32 = arith.divf %30, %31 : vector<2x24xf32>
    %33 = vector.extract_strided_slice %26 {offsets = [0, 24], sizes = [2, 8], strides = [1, 1]} : vector<2x32xf32> to vector<2x8xf32>
    %34 = math.tanh %33 : vector<2x8xf32>
    %35 = vector.extract_strided_slice %32 {offsets = [0, 0], sizes = [2, 8], strides = [1, 1]} : vector<2x24xf32> to vector<2x8xf32>
    %36 = vector.extract_strided_slice %32 {offsets = [0, 8], sizes = [2, 8], strides = [1, 1]} : vector<2x24xf32> to vector<2x8xf32>
    %37 = vector.extract_strided_slice %32 {offsets = [0, 16], sizes = [2, 8], strides = [1, 1]} : vector<2x24xf32> to vector<2x8xf32>
    %38 = arith.mulf %36, %23 : vector<2x8xf32>
    %39 = arith.mulf %35, %34 : vector<2x8xf32>
    %40 = arith.addf %38, %39 : vector<2x8xf32>
    %41 = math.tanh %40 : vector<2x8xf32>
    %42 = arith.mulf %37, %41 : vector<2x8xf32>
    %c1 = arith.constant 1 : index
    %c0_13 = arith.constant 0 : index
    %43 = tpu.strided_load %arg3[%c1, %c0_13] {strides = array<i32: 8, 1>} : memref<16x32xf32, #tpu.memory_space<vmem>>, vector<2x32xf32>
    %cst_14 = arith.constant dense<0.000000e+00> : vector<2x32xf32>
    %44 = tpu.matmul %42, %5, %cst_14 {dimension_numbers = #tpu.dot_dimension_numbers<[1], [0], [0], [1], [0, 0, 1, 1], [], []>} : vector<2x8xf32>, vector<8x32xf32>, vector<2x32xf32> -> vector<2x32xf32>
    %45 = arith.addf %43, %44 : vector<2x32xf32>
    %46 = vector.extract_strided_slice %45 {offsets = [0, 0], sizes = [2, 24], strides = [1, 1]} : vector<2x32xf32> to vector<2x24xf32>
    %47 = arith.negf %46 : vector<2x24xf32>
    %48 = math.exp %47 : vector<2x24xf32>
    %cst_15 = arith.constant 1.000000e+00 : f32
    %49 = vector.broadcast %cst_15 : f32 to vector<2x24xf32>
    %50 = arith.addf %49, %48 : vector<2x24xf32>
    %51 = arith.divf %49, %50 : vector<2x24xf32>
    %52 = vector.extract_strided_slice %45 {offsets = [0, 24], sizes = [2, 8], strides = [1, 1]} : vector<2x32xf32> to vector<2x8xf32>
    %53 = math.tanh %52 : vector<2x8xf32>
    %54 = vector.extract_strided_slice %51 {offsets = [0, 0], sizes = [2, 8], strides = [1, 1]} : vector<2x24xf32> to vector<2x8xf32>
    %55 = vector.extract_strided_slice %51 {offsets = [0, 8], sizes = [2, 8], strides = [1, 1]} : vector<2x24xf32> to vector<2x8xf32>
    %56 = vector.extract_strided_slice %51 {offsets = [0, 16], sizes = [2, 8], strides = [1, 1]} : vector<2x24xf32> to vector<2x8xf32>
    %57 = arith.mulf %55, %40 : vector<2x8xf32>
    %58 = arith.mulf %54, %53 : vector<2x8xf32>
    %59 = arith.addf %57, %58 : vector<2x8xf32>
    %60 = math.tanh %59 : vector<2x8xf32>
    %61 = arith.mulf %56, %60 : vector<2x8xf32>
    %c2 = arith.constant 2 : index
    %c0_16 = arith.constant 0 : index
    %62 = tpu.strided_load %arg3[%c2, %c0_16] {strides = array<i32: 8, 1>} : memref<16x32xf32, #tpu.memory_space<vmem>>, vector<2x32xf32>
    %cst_17 = arith.constant dense<0.000000e+00> : vector<2x32xf32>
    %63 = tpu.matmul %61, %5, %cst_17 {dimension_numbers = #tpu.dot_dimension_numbers<[1], [0], [0], [1], [0, 0, 1, 1], [], []>} : vector<2x8xf32>, vector<8x32xf32>, vector<2x32xf32> -> vector<2x32xf32>
    %64 = arith.addf %62, %63 : vector<2x32xf32>
    %65 = vector.extract_strided_slice %64 {offsets = [0, 0], sizes = [2, 24], strides = [1, 1]} : vector<2x32xf32> to vector<2x24xf32>
    %66 = arith.negf %65 : vector<2x24xf32>
    %67 = math.exp %66 : vector<2x24xf32>
    %cst_18 = arith.constant 1.000000e+00 : f32
    %68 = vector.broadcast %cst_18 : f32 to vector<2x24xf32>
    %69 = arith.addf %68, %67 : vector<2x24xf32>
    %70 = arith.divf %68, %69 : vector<2x24xf32>
    %71 = vector.extract_strided_slice %64 {offsets = [0, 24], sizes = [2, 8], strides = [1, 1]} : vector<2x32xf32> to vector<2x8xf32>
    %72 = math.tanh %71 : vector<2x8xf32>
    %73 = vector.extract_strided_slice %70 {offsets = [0, 0], sizes = [2, 8], strides = [1, 1]} : vector<2x24xf32> to vector<2x8xf32>
    %74 = vector.extract_strided_slice %70 {offsets = [0, 8], sizes = [2, 8], strides = [1, 1]} : vector<2x24xf32> to vector<2x8xf32>
    %75 = vector.extract_strided_slice %70 {offsets = [0, 16], sizes = [2, 8], strides = [1, 1]} : vector<2x24xf32> to vector<2x8xf32>
    %76 = arith.mulf %74, %59 : vector<2x8xf32>
    %77 = arith.mulf %73, %72 : vector<2x8xf32>
    %78 = arith.addf %76, %77 : vector<2x8xf32>
    %79 = math.tanh %78 : vector<2x8xf32>
    %80 = arith.mulf %75, %79 : vector<2x8xf32>
    %c3 = arith.constant 3 : index
    %c0_19 = arith.constant 0 : index
    %81 = tpu.strided_load %arg3[%c3, %c0_19] {strides = array<i32: 8, 1>} : memref<16x32xf32, #tpu.memory_space<vmem>>, vector<2x32xf32>
    %cst_20 = arith.constant dense<0.000000e+00> : vector<2x32xf32>
    %82 = tpu.matmul %80, %5, %cst_20 {dimension_numbers = #tpu.dot_dimension_numbers<[1], [0], [0], [1], [0, 0, 1, 1], [], []>} : vector<2x8xf32>, vector<8x32xf32>, vector<2x32xf32> -> vector<2x32xf32>
    %83 = arith.addf %81, %82 : vector<2x32xf32>
    %84 = vector.extract_strided_slice %83 {offsets = [0, 0], sizes = [2, 24], strides = [1, 1]} : vector<2x32xf32> to vector<2x24xf32>
    %85 = arith.negf %84 : vector<2x24xf32>
    %86 = math.exp %85 : vector<2x24xf32>
    %cst_21 = arith.constant 1.000000e+00 : f32
    %87 = vector.broadcast %cst_21 : f32 to vector<2x24xf32>
    %88 = arith.addf %87, %86 : vector<2x24xf32>
    %89 = arith.divf %87, %88 : vector<2x24xf32>
    %90 = vector.extract_strided_slice %83 {offsets = [0, 24], sizes = [2, 8], strides = [1, 1]} : vector<2x32xf32> to vector<2x8xf32>
    %91 = math.tanh %90 : vector<2x8xf32>
    %92 = vector.extract_strided_slice %89 {offsets = [0, 0], sizes = [2, 8], strides = [1, 1]} : vector<2x24xf32> to vector<2x8xf32>
    %93 = vector.extract_strided_slice %89 {offsets = [0, 8], sizes = [2, 8], strides = [1, 1]} : vector<2x24xf32> to vector<2x8xf32>
    %94 = vector.extract_strided_slice %89 {offsets = [0, 16], sizes = [2, 8], strides = [1, 1]} : vector<2x24xf32> to vector<2x8xf32>
    %95 = arith.mulf %93, %78 : vector<2x8xf32>
    %96 = arith.mulf %92, %91 : vector<2x8xf32>
    %97 = arith.addf %95, %96 : vector<2x8xf32>
    %98 = math.tanh %97 : vector<2x8xf32>
    %99 = arith.mulf %94, %98 : vector<2x8xf32>
    %c4 = arith.constant 4 : index
    %c0_22 = arith.constant 0 : index
    %100 = tpu.strided_load %arg3[%c4, %c0_22] {strides = array<i32: 8, 1>} : memref<16x32xf32, #tpu.memory_space<vmem>>, vector<2x32xf32>
    %cst_23 = arith.constant dense<0.000000e+00> : vector<2x32xf32>
    %101 = tpu.matmul %99, %5, %cst_23 {dimension_numbers = #tpu.dot_dimension_numbers<[1], [0], [0], [1], [0, 0, 1, 1], [], []>} : vector<2x8xf32>, vector<8x32xf32>, vector<2x32xf32> -> vector<2x32xf32>
    %102 = arith.addf %100, %101 : vector<2x32xf32>
    %103 = vector.extract_strided_slice %102 {offsets = [0, 0], sizes = [2, 24], strides = [1, 1]} : vector<2x32xf32> to vector<2x24xf32>
    %104 = arith.negf %103 : vector<2x24xf32>
    %105 = math.exp %104 : vector<2x24xf32>
    %cst_24 = arith.constant 1.000000e+00 : f32
    %106 = vector.broadcast %cst_24 : f32 to vector<2x24xf32>
    %107 = arith.addf %106, %105 : vector<2x24xf32>
    %108 = arith.divf %106, %107 : vector<2x24xf32>
    %109 = vector.extract_strided_slice %102 {offsets = [0, 24], sizes = [2, 8], strides = [1, 1]} : vector<2x32xf32> to vector<2x8xf32>
    %110 = math.tanh %109 : vector<2x8xf32>
    %111 = vector.extract_strided_slice %108 {offsets = [0, 0], sizes = [2, 8], strides = [1, 1]} : vector<2x24xf32> to vector<2x8xf32>
    %112 = vector.extract_strided_slice %108 {offsets = [0, 8], sizes = [2, 8], strides = [1, 1]} : vector<2x24xf32> to vector<2x8xf32>
    %113 = vector.extract_strided_slice %108 {offsets = [0, 16], sizes = [2, 8], strides = [1, 1]} : vector<2x24xf32> to vector<2x8xf32>
    %114 = arith.mulf %112, %97 : vector<2x8xf32>
    %115 = arith.mulf %111, %110 : vector<2x8xf32>
    %116 = arith.addf %114, %115 : vector<2x8xf32>
    %117 = math.tanh %116 : vector<2x8xf32>
    %118 = arith.mulf %113, %117 : vector<2x8xf32>
    %c5 = arith.constant 5 : index
    %c0_25 = arith.constant 0 : index
    %119 = tpu.strided_load %arg3[%c5, %c0_25] {strides = array<i32: 8, 1>} : memref<16x32xf32, #tpu.memory_space<vmem>>, vector<2x32xf32>
    %cst_26 = arith.constant dense<0.000000e+00> : vector<2x32xf32>
    %120 = tpu.matmul %118, %5, %cst_26 {dimension_numbers = #tpu.dot_dimension_numbers<[1], [0], [0], [1], [0, 0, 1, 1], [], []>} : vector<2x8xf32>, vector<8x32xf32>, vector<2x32xf32> -> vector<2x32xf32>
    %121 = arith.addf %119, %120 : vector<2x32xf32>
    %122 = vector.extract_strided_slice %121 {offsets = [0, 0], sizes = [2, 24], strides = [1, 1]} : vector<2x32xf32> to vector<2x24xf32>
    %123 = arith.negf %122 : vector<2x24xf32>
    %124 = math.exp %123 : vector<2x24xf32>
    %cst_27 = arith.constant 1.000000e+00 : f32
    %125 = vector.broadcast %cst_27 : f32 to vector<2x24xf32>
    %126 = arith.addf %125, %124 : vector<2x24xf32>
    %127 = arith.divf %125, %126 : vector<2x24xf32>
    %128 = vector.extract_strided_slice %121 {offsets = [0, 24], sizes = [2, 8], strides = [1, 1]} : vector<2x32xf32> to vector<2x8xf32>
    %129 = math.tanh %128 : vector<2x8xf32>
    %130 = vector.extract_strided_slice %127 {offsets = [0, 0], sizes = [2, 8], strides = [1, 1]} : vector<2x24xf32> to vector<2x8xf32>
    %131 = vector.extract_strided_slice %127 {offsets = [0, 8], sizes = [2, 8], strides = [1, 1]} : vector<2x24xf32> to vector<2x8xf32>
    %132 = vector.extract_strided_slice %127 {offsets = [0, 16], sizes = [2, 8], strides = [1, 1]} : vector<2x24xf32> to vector<2x8xf32>
    %133 = arith.mulf %131, %116 : vector<2x8xf32>
    %134 = arith.mulf %130, %129 : vector<2x8xf32>
    %135 = arith.addf %133, %134 : vector<2x8xf32>
    %136 = math.tanh %135 : vector<2x8xf32>
    %137 = arith.mulf %132, %136 : vector<2x8xf32>
    %c6 = arith.constant 6 : index
    %c0_28 = arith.constant 0 : index
    %138 = tpu.strided_load %arg3[%c6, %c0_28] {strides = array<i32: 8, 1>} : memref<16x32xf32, #tpu.memory_space<vmem>>, vector<2x32xf32>
    %cst_29 = arith.constant dense<0.000000e+00> : vector<2x32xf32>
    %139 = tpu.matmul %137, %5, %cst_29 {dimension_numbers = #tpu.dot_dimension_numbers<[1], [0], [0], [1], [0, 0, 1, 1], [], []>} : vector<2x8xf32>, vector<8x32xf32>, vector<2x32xf32> -> vector<2x32xf32>
    %140 = arith.addf %138, %139 : vector<2x32xf32>
    %141 = vector.extract_strided_slice %140 {offsets = [0, 0], sizes = [2, 24], strides = [1, 1]} : vector<2x32xf32> to vector<2x24xf32>
    %142 = arith.negf %141 : vector<2x24xf32>
    %143 = math.exp %142 : vector<2x24xf32>
    %cst_30 = arith.constant 1.000000e+00 : f32
    %144 = vector.broadcast %cst_30 : f32 to vector<2x24xf32>
    %145 = arith.addf %144, %143 : vector<2x24xf32>
    %146 = arith.divf %144, %145 : vector<2x24xf32>
    %147 = vector.extract_strided_slice %140 {offsets = [0, 24], sizes = [2, 8], strides = [1, 1]} : vector<2x32xf32> to vector<2x8xf32>
    %148 = math.tanh %147 : vector<2x8xf32>
    %149 = vector.extract_strided_slice %146 {offsets = [0, 0], sizes = [2, 8], strides = [1, 1]} : vector<2x24xf32> to vector<2x8xf32>
    %150 = vector.extract_strided_slice %146 {offsets = [0, 8], sizes = [2, 8], strides = [1, 1]} : vector<2x24xf32> to vector<2x8xf32>
    %151 = vector.extract_strided_slice %146 {offsets = [0, 16], sizes = [2, 8], strides = [1, 1]} : vector<2x24xf32> to vector<2x8xf32>
    %152 = arith.mulf %150, %135 : vector<2x8xf32>
    %153 = arith.mulf %149, %148 : vector<2x8xf32>
    %154 = arith.addf %152, %153 : vector<2x8xf32>
    %155 = math.tanh %154 : vector<2x8xf32>
    %156 = arith.mulf %151, %155 : vector<2x8xf32>
    %c7 = arith.constant 7 : index
    %c0_31 = arith.constant 0 : index
    %157 = tpu.strided_load %arg3[%c7, %c0_31] {strides = array<i32: 8, 1>} : memref<16x32xf32, #tpu.memory_space<vmem>>, vector<2x32xf32>
    %cst_32 = arith.constant dense<0.000000e+00> : vector<2x32xf32>
    %158 = tpu.matmul %156, %5, %cst_32 {dimension_numbers = #tpu.dot_dimension_numbers<[1], [0], [0], [1], [0, 0, 1, 1], [], []>} : vector<2x8xf32>, vector<8x32xf32>, vector<2x32xf32> -> vector<2x32xf32>
    %159 = arith.addf %157, %158 : vector<2x32xf32>
    %160 = vector.extract_strided_slice %159 {offsets = [0, 0], sizes = [2, 24], strides = [1, 1]} : vector<2x32xf32> to vector<2x24xf32>
    %161 = arith.negf %160 : vector<2x24xf32>
    %162 = math.exp %161 : vector<2x24xf32>
    %cst_33 = arith.constant 1.000000e+00 : f32
    %163 = vector.broadcast %cst_33 : f32 to vector<2x24xf32>
    %164 = arith.addf %163, %162 : vector<2x24xf32>
    %165 = arith.divf %163, %164 : vector<2x24xf32>
    %166 = vector.extract_strided_slice %159 {offsets = [0, 24], sizes = [2, 8], strides = [1, 1]} : vector<2x32xf32> to vector<2x8xf32>
    %167 = math.tanh %166 : vector<2x8xf32>
    %168 = vector.extract_strided_slice %165 {offsets = [0, 0], sizes = [2, 8], strides = [1, 1]} : vector<2x24xf32> to vector<2x8xf32>
    %169 = vector.extract_strided_slice %165 {offsets = [0, 8], sizes = [2, 8], strides = [1, 1]} : vector<2x24xf32> to vector<2x8xf32>
    %170 = vector.extract_strided_slice %165 {offsets = [0, 16], sizes = [2, 8], strides = [1, 1]} : vector<2x24xf32> to vector<2x8xf32>
    %171 = arith.mulf %169, %154 : vector<2x8xf32>
    %172 = arith.mulf %168, %167 : vector<2x8xf32>
    %173 = arith.addf %171, %172 : vector<2x8xf32>
    %174 = math.tanh %173 : vector<2x8xf32>
    %175 = arith.mulf %170, %174 : vector<2x8xf32>
    %c16_34 = arith.constant 16 : index
    %c0_35 = arith.constant 0 : index
    %176 = vector.load %arg2[%c16_34, %c0_35] : memref<18x16xf32, #tpu.memory_space<vmem>>, vector<2x8xf32>
    tpu.vector_store %arg2[%c16_34, %c0_35], %175 {strides = array<i32>} : memref<18x16xf32, #tpu.memory_space<vmem>>, vector<2x8xf32>,
    %c16_36 = arith.constant 16 : index
    %c8 = arith.constant 8 : index
    %177 = vector.load %arg2[%c16_36, %c8] : memref<18x16xf32, #tpu.memory_space<vmem>>, vector<2x8xf32>
    tpu.vector_store %arg2[%c16_36, %c8], %173 {strides = array<i32>} : memref<18x16xf32, #tpu.memory_space<vmem>>, vector<2x8xf32>,
    %178 = vector.shape_cast %42 : vector<2x8xf32> to vector<2x1x8xf32>
    %179 = vector.shape_cast %61 : vector<2x8xf32> to vector<2x1x8xf32>
    %180 = vector.shape_cast %80 : vector<2x8xf32> to vector<2x1x8xf32>
    %181 = vector.shape_cast %99 : vector<2x8xf32> to vector<2x1x8xf32>
    %182 = vector.shape_cast %118 : vector<2x8xf32> to vector<2x1x8xf32>
    %183 = vector.shape_cast %137 : vector<2x8xf32> to vector<2x1x8xf32>
    %184 = vector.shape_cast %156 : vector<2x8xf32> to vector<2x1x8xf32>
    %185 = vector.shape_cast %175 : vector<2x8xf32> to vector<2x1x8xf32>
    %186 = tpu.concatenate %178, %179, %180, %181, %182, %183, %184, %185 in 1 : vector<2x1x8xf32>, vector<2x1x8xf32>, vector<2x1x8xf32>, vector<2x1x8xf32>, vector<2x1x8xf32>, vector<2x1x8xf32>, vector<2x1x8xf32>, vector<2x1x8xf32> -> vector<2x8x8xf32>
    %187 = vector.shape_cast %186 : vector<2x8x8xf32> to vector<16x8xf32>
    %cst_37 = arith.constant 0.000000e+00 : f32
    %188 = vector.broadcast %cst_37 : f32 to vector<16x8xf32>
    %189 = arith.maximumf %187, %188 : vector<16x8xf32>
    %cst_38 = arith.constant dense<0.000000e+00> : vector<16x8xf32>
    %190 = tpu.matmul %189, %6, %cst_38 {dimension_numbers = #tpu.dot_dimension_numbers<[1], [0], [0], [1], [0, 0, 1, 1], [], []>} : vector<16x8xf32>, vector<8x8xf32>, vector<16x8xf32> -> vector<16x8xf32>
    %191 = vector.broadcast %10 : vector<1x8xf32> to vector<16x8xf32>
    %192 = arith.addf %190, %191 : vector<16x8xf32>
    %cst_39 = arith.constant 0.000000e+00 : f32
    %193 = vector.broadcast %cst_39 : f32 to vector<16x8xf32>
    %194 = arith.maximumf %192, %193 : vector<16x8xf32>
    %cst_40 = arith.constant dense<0.000000e+00> : vector<16x8xf32>
    %195 = tpu.matmul %194, %7, %cst_40 {dimension_numbers = #tpu.dot_dimension_numbers<[1], [0], [0], [1], [0, 0, 1, 1], [], []>} : vector<16x8xf32>, vector<8x8xf32>, vector<16x8xf32> -> vector<16x8xf32>
    %196 = vector.broadcast %11 : vector<1x8xf32> to vector<16x8xf32>
    %197 = arith.addf %195, %196 : vector<16x8xf32>
    %cst_41 = arith.constant dense<0xFF800000> : vector<16xf32>
    %198 = vector.multi_reduction <maximumf>, %197, %cst_41 [1] : vector<16x8xf32> to vector<16xf32>
    %199 = vector.shape_cast %198 : vector<16xf32> to vector<16x1xf32>
    %200 = vector.broadcast %199 : vector<16x1xf32> to vector<16x8xf32>
    %201 = arith.subf %197, %200 : vector<16x8xf32>
    %202 = math.exp %201 : vector<16x8xf32>
    %cst_42 = arith.constant dense<0.000000e+00> : vector<16xf32>
    %203 = vector.multi_reduction <add>, %202, %cst_42 [1] : vector<16x8xf32> to vector<16xf32>
    %204 = vector.shape_cast %203 : vector<16xf32> to vector<16x1xf32>
    %205 = tpu.reciprocal %204 : vector<16x1xf32> -> vector<16x1xf32>
    %206 = vector.broadcast %205 : vector<16x1xf32> to vector<16x8xf32>
    %207 = arith.mulf %202, %206 : vector<16x8xf32>
    %c0_43 = arith.constant 0 : index
    %c0_44 = arith.constant 0 : index
    %208 = vector.load %arg2[%c0_43, %c0_44] : memref<18x16xf32, #tpu.memory_space<vmem>>, vector<16x8xf32>
    tpu.vector_store %arg2[%c0_43, %c0_44], %207 {strides = array<i32>} : memref<18x16xf32, #tpu.memory_space<vmem>>, vector<16x8xf32>,
    return
  }
}

</mosaic_0001>

<bundles_post_ra>
// kernel: baseline_lstm_net_forward.1
= control target key start
LH: loop header
LB: loop body
LE: loop exit
PB: predicated region body
PF: predicated region fallthrough
CT: control target
= control target key end

     0   :  { %vm16_vm0 = vcmask 64512   ;;  %s919_s17 = smov 120   ;;  %s921_s20 = smov 8   ;;  %vm85_vm1 = vcmask 261120   ;;  %vm659_vm14 = vcmask 1040384   ;;  %vm662_vm15 = vcmask 1041408   ;;  %s1065_s1 = inlined_call_operand.vmem [shape: f32[9,88], index: 1, kind: input, shape index: {}]   ;;  %s1066_s0 = inlined_call_operand.vmem [shape: f32[20,8], index: 0, kind: input, shape index: {}]   ;;  %s1067_s2 = inlined_call_operand.vmem [shape: f32[18,16], index: 2, kind: output, shape index: {}]  }
   0x1   :  { %v945_v0 = vld [vmem:[%s1065_s1] sm:$0xff]  ;;  %v950_v1 = vld [vmem:[%s1065_s1 + $0x8] ss:$0 sm:$0xff]  ;;  %s920_s1 = smov 88   ;;  %v89_v4 = vld [vmem:[%s1066_s0 + $0x12] sm:$0x3] }
   0x2   :  { %836 = vmatpush.msra.mxu2 %v945_v0  ;;  %v14_v2 = vld [vmem:[%s1066_s0 + $0x8] sm:$0xff]  ;;  %38 = vmatpush.msra.mxu0 %v945_v0  ;;  %v13_v3 = vld [vmem:[%s1066_s0] sm:$0xff]  ;;  %v88_v7 = vld [vmem:[%s1066_s0 + $0x10] sm:$0x3]  ;;  %s922_s0 = smov 104   ;;  %s923_s23 = smov 112  }
   0x3   :  { %813 = vmatmul.msk.f32.vlgmr.msra.gmra.mxu2 %vm16_vm0, %v14_v2  ;;  %812 = vmatmul.msk.f32.vlgmr.msra.gmra.mxu0 %vm16_vm0, %v13_v3  ;;  %s924_s24 = smov 56   ;;  %s925_s25 = smov 48  }
   0x4   :  { %49 = vrot.lane.b32.xlu0 %v945_v0, %s919_s17  ;;  %53 = vrot.lane.b32.xlu1 %v950_v1, %s919_s17  ;;  %s926_s26 = smov 80  }
   0x5   :  { %139 = vrot.lane.b32.xlu2 %v89_v4, %s921_s20 }
   0xc   :  { %91 = vrot.lane.b32.xlu0 %v945_v0, %s920_s1 }
  0x5f   :  { %v140_v38 = vpop.permute.xlu2 %139 }
  0x76   :  { %v50_v5 = vpop.permute.xlu0 %49  ;;  %v54_v14 = vpop.permute.xlu1 %53 }
  0x77   :  { %77 = vmatpush.msra.mxu1 %v50_v5  ;;  %837 = vmatpush.msra.mxu3 %v50_v5 }
  0x7e   :  { %v970_v6 = vpop.permute.xlu0 %91 }
  0x7f   :  { %112 = vmatpush.msrb.mxu2 %v970_v6  ;;  %181 = vmatpush.msrb.mxu3 %v970_v6 }
  0x80   :  { %v40_v8 = vpop.f32.mrf.mxu0  ;;  %376 = vmatpush.msrb.mxu0 %v970_v6  ;;  %816 = vmatmul.msk.f32.vlgmr.msrb.gmra.mxu2 %vm16_vm0, %v88_v7 }
  0x81   :  { %246 = vmatpush.msra.mxu2 %v970_v6  ;;  %v41_v9 = vadd.f32 %v950_v1, %v40_v8  ;;  %441 = vmatpush.msrb.mxu1 %v970_v6 }
  0x83   :  { %506 = vmatpush.msrb.mxu2 %v970_v6  ;;  %v46_v10 = vmax.f32 %v41_v9, 0.0 }
  0x85   :  { %814 = vmatmul.msk.f32.vlgmr.msra.gmra.mxu1 %vm16_vm0, %v46_v10 }
  0x86   :  { %v43_v11 = vpop.f32.mrf.mxu2 }
  0x87   :  { %v44_v12 = vadd.f32 %v950_v1, %v43_v11 }
  0x89   :  { %v47_v13 = vmax.f32 %v44_v12, 0.0 }
  0x8b   :  { %815 = vmatmul.msk.f32.vlgmr.msra.gmra.mxu3 %vm16_vm0, %v47_v13 }
  0x8c   :  { %311 = vmatpush.msra.mxu3 %v970_v6 }
 0x102   :  { %v79_v15 = vpop.f32.mrf.mxu1 }
 0x103   :  { %v80_v16 = vadd.f32 %v79_v15, %v54_v14  ;;  %v114_v19 = vpop.f32.mrf.mxu2 }
 0x105   :  { %86 = vst.msk [vmem:[#allocation2] sm:$0xff] %vm85_vm1, %v80_v16 }
 0x10e   :  { %v82_v17 = vpop.f32.mrf.mxu3 }
 0x10f   :  { %v83_v18 = vadd.f32 %v82_v17, %v54_v14 }
 0x111   :  { %87 = vst.msk [vmem:[#allocation2 + $0x8] sm:$0xff] %vm85_vm1, %v83_v18 }
 0x118   :  { %v90_v20 = vld [vmem:[#allocation2] ss:$8 sm:$0x3]  ;;  %v160_v46 = vld [vmem:[#allocation2 + $0x1] ss:$8 sm:$0x3] }
 0x119   :  { %v117_v21 = vadd.f32 %v114_v19, %v90_v20  ;;  %v225_v10 = vld [vmem:[#allocation2 + $0x2] ss:$8 sm:$0x3] }
 0x11b   :  { %847 = vtanh.f32 %v117_v21  ;;  %v817_v23 = vmul.f32 -1.442695, %v117_v21 }
 0x11d   :  { %849 = vpow2.f32 %v817_v23 }
 0x121   :  { %v848_v22 = vpop.eup %847 }
 0x122   :  { %144 = vrot.lane.b32.xlu1 %v848_v22, %s922_s0 }
 0x123   :  { %v850_v24 = vpop.eup %849 }
 0x124   :  { %v121_v25 = vadd.f32 1.0, %v850_v24 }
 0x126   :  { %851 = vrcp.f32 %v121_v25  ;;  %v133_v31 = vand.u32 2147483648, %v121_v25  ;;  %vm127_vm3 = vweird.f32 %v121_v25  ;;  %v131_v32 = vand.u32 2147483647, %v121_v25 }
 0x128   :  { %v134_v34 = vor.u32 1.1754944e-38, %v133_v31  ;;  %vm132_vm5 = vcmp.eq.f32.partialorder %v131_v32, 8.507059e+37 }
 0x12c   :  { %v852_v26 = vpop.eup %851 }
 0x12d   :  { %v123_v27 = vmul.f32 %v852_v26, %v121_v25  ;;  %vm128_vm2 = vweird.f32 %v852_v26 }
 0x12e   :  { %vm129_vm4 = vmor %vm127_vm3, %vm128_vm2 }
 0x12f   :  { %v124_v28 = vsub.f32 1.0, %v123_v27 }
 0x131   :  { %v125_v29 = vmul.f32 %v852_v26, %v124_v28 }
 0x133   :  { %v126_v30 = vadd.f32 %v852_v26, %v125_v29 }
 0x135   :  { %v130_v33 = vsel %vm129_vm4, %v852_v26, %v126_v30 }
 0x136   :  { %v135_v35 = vsel %vm132_vm5, %v134_v34, %v130_v33  ;;  %vm665_vm5 = vcmask 1042432  }
 0x137   :  { %v142_v39 = vmul.f32 %v140_v38, %v135_v35 }
 0x194   :  { %v145_v36 = vpop.permute.xlu1 %144 }
 0x195   :  { %v147_v37 = vmul.f32 %v145_v36, %v135_v35 }
 0x197   :  { %149 = vrot.lane.b32.xlu2 %v147_v37, %s921_s20 }
 0x1f1   :  { %v150_v40 = vpop.permute.xlu2 %149 }
 0x1f2   :  { %v152_v41 = vadd.f32 %v150_v40, %v142_v39 }
 0x1f4   :  { %853 = vtanh.f32 %v152_v41 }
 0x1fa   :  { %v854_v42 = vpop.eup %853 }
 0x1fb   :  { %155 = vrot.lane.b32.xlu0 %v854_v42, %s921_s20 }
 0x26d   :  { %v156_v43 = vpop.permute.xlu0 %155 }
 0x26e   :  { %v990_v44 = vmul.f32 %v156_v43, %v135_v35 }
 0x270   :  { %162 = vrot.lane.b32.xlu1 %v990_v44, %s923_s23  ;;  %v622_v40 = vrot.slane %v990_v44, 1 }
 0x2e2   :  { %v163_v45 = vpop.permute.xlu1 %162 }
 0x2e3   :  { %818 = vmatmul.msk.f32.vlgmr.msrb.gmra.mxu3 %vm16_vm0, %v163_v45 }
 0x2e4   :  { %571 = vmatpush.msrb.mxu3 %v970_v6 }
 0x366   :  { %v183_v47 = vpop.f32.mrf.mxu3 }
 0x367   :  { %v186_v48 = vadd.f32 %v183_v47, %v160_v46 }
 0x369   :  { %855 = vtanh.f32 %v186_v48  ;;  %v819_v50 = vmul.f32 -1.442695, %v186_v48  ;;  %v290_v48 = vld [vmem:[#allocation2 + $0x3] ss:$8 sm:$0x3] }
 0x36b   :  { %857 = vpow2.f32 %v819_v50 }
 0x36f   :  { %v856_v49 = vpop.eup %855 }
 0x370   :  { %209 = vrot.lane.b32.xlu2 %v856_v49, %s922_s0 }
 0x371   :  { %v858_v51 = vpop.eup %857 }
 0x372   :  { %v190_v52 = vadd.f32 1.0, %v858_v51 }
 0x374   :  { %859 = vrcp.f32 %v190_v52  ;;  %v202_v58 = vand.u32 2147483648, %v190_v52  ;;  %vm196_vm7 = vweird.f32 %v190_v52  ;;  %v200_v59 = vand.u32 2147483647, %v190_v52 }
 0x376   :  { %v203_v61 = vor.u32 1.1754944e-38, %v202_v58  ;;  %vm201_vm9 = vcmp.eq.f32.partialorder %v200_v59, 8.507059e+37 }
 0x37a   :  { %v860_v53 = vpop.eup %859 }
 0x37b   :  { %v192_v54 = vmul.f32 %v860_v53, %v190_v52  ;;  %vm197_vm6 = vweird.f32 %v860_v53 }
 0x37c   :  { %vm198_vm8 = vmor %vm196_vm7, %vm197_vm6 }
 0x37d   :  { %v193_v55 = vsub.f32 1.0, %v192_v54 }
 0x37f   :  { %v194_v56 = vmul.f32 %v860_v53, %v193_v55 }
 0x381   :  { %v195_v57 = vadd.f32 %v860_v53, %v194_v56 }
 0x383   :  { %v199_v60 = vsel %vm198_vm8, %v860_v53, %v195_v57 }
 0x384   :  { %v204_v63 = vsel %vm201_vm9, %v203_v61, %v199_v60 }
 0x385   :  { %v207_v3 = vmul.f32 %v204_v63, %v152_v41 }
 0x3ca   :  { %v210_v62 = vpop.permute.xlu2 %209 }
 0x3cb   :  { %v212_v2 = vmul.f32 %v210_v62, %v204_v63 }
 0x3cd   :  { %214 = vrot.lane.b32.xlu0 %v212_v2, %s921_s20 }
 0x43f   :  { %v215_v4 = vpop.permute.xlu0 %214 }
 0x440   :  { %v217_v5 = vadd.f32 %v215_v4, %v207_v3 }
 0x442   :  { %861 = vtanh.f32 %v217_v5 }
 0x448   :  { %v862_v6 = vpop.eup %861 }
 0x449   :  { %220 = vrot.lane.b32.xlu1 %v862_v6, %s921_s20 }
 0x4bb   :  { %v221_v7 = vpop.permute.xlu1 %220 }
 0x4bc   :  { %v223_v8 = vmul.f32 %v221_v7, %v204_v63 }
 0x4be   :  { %227 = vrot.lane.b32.xlu2 %v223_v8, %s923_s23  ;;  %v624_v33 = vrot.slane %v223_v8, 1  ;;  %v631_v34 = vperm.slane %v223_v8, 0 }
 0x4c0   :  { %v632_v37 = vperm.slane %v624_v33, 0  ;;  %v660_v41 = vsel %vm659_vm14, %v990_v44, %v631_v34 }
 0x4c2   :  { %v661_v45 = vsel %vm659_vm14, %v622_v40, %v632_v37 }
 0x518   :  { %v228_v9 = vpop.permute.xlu2 %227 }
 0x519   :  { %820 = vmatmul.msk.f32.vlgmr.msra.gmra.mxu2 %vm16_vm0, %v228_v9 }
 0x59c   :  { %v248_v11 = vpop.f32.mrf.mxu2 }
 0x59d   :  { %v251_v12 = vadd.f32 %v248_v11, %v225_v10 }
 0x59f   :  { %863 = vtanh.f32 %v251_v12  ;;  %v821_v14 = vmul.f32 -1.442695, %v251_v12 }
 0x5a1   :  { %865 = vpow2.f32 %v821_v14 }
 0x5a5   :  { %v864_v13 = vpop.eup %863 }
 0x5a6   :  { %274 = vrot.lane.b32.xlu0 %v864_v13, %s922_s0 }
 0x5a7   :  { %v866_v15 = vpop.eup %865 }
 0x5a8   :  { %v255_v16 = vadd.f32 1.0, %v866_v15 }
 0x5aa   :  { %867 = vrcp.f32 %v255_v16  ;;  %v267_v22 = vand.u32 2147483648, %v255_v16  ;;  %vm261_vm11 = vweird.f32 %v255_v16  ;;  %v265_v23 = vand.u32 2147483647, %v255_v16 }
 0x5ac   :  { %v268_v25 = vor.u32 1.1754944e-38, %v267_v22  ;;  %vm266_vm13 = vcmp.eq.f32.partialorder %v265_v23, 8.507059e+37 }
 0x5b0   :  { %v868_v17 = vpop.eup %867 }
 0x5b1   :  { %v257_v18 = vmul.f32 %v868_v17, %v255_v16  ;;  %vm262_vm10 = vweird.f32 %v868_v17  ;;  %v355_v16 = vld [vmem:[#allocation2 + $0x4] ss:$8 sm:$0x3] }
 0x5b2   :  { %vm263_vm12 = vmor %vm261_vm11, %vm262_vm10  ;;  %vm668_vm10 = vcmask 1043456  }
 0x5b3   :  { %v258_v19 = vsub.f32 1.0, %v257_v18 }
 0x5b5   :  { %v259_v20 = vmul.f32 %v868_v17, %v258_v19 }
 0x5b7   :  { %v260_v21 = vadd.f32 %v868_v17, %v259_v20 }
 0x5b9   :  { %v264_v24 = vsel %vm263_vm12, %v868_v17, %v260_v21 }
 0x5ba   :  { %v269_v27 = vsel %vm266_vm13, %v268_v25, %v264_v24 }
 0x5bb   :  { %v272_v29 = vmul.f32 %v269_v27, %v217_v5 }
 0x618   :  { %v275_v26 = vpop.permute.xlu0 %274 }
 0x619   :  { %v277_v28 = vmul.f32 %v275_v26, %v269_v27 }
 0x61b   :  { %279 = vrot.lane.b32.xlu1 %v277_v28, %s921_s20 }
 0x68d   :  { %v280_v30 = vpop.permute.xlu1 %279 }
 0x68e   :  { %v282_v31 = vadd.f32 %v280_v30, %v272_v29 }
 0x690   :  { %869 = vtanh.f32 %v282_v31 }
 0x696   :  { %v870_v32 = vpop.eup %869 }
 0x697   :  { %285 = vrot.lane.b32.xlu2 %v870_v32, %s921_s20 }
 0x6f1   :  { %v286_v35 = vpop.permute.xlu2 %285 }
 0x6f2   :  { %v288_v36 = vmul.f32 %v286_v35, %v269_v27 }
 0x6f4   :  { %v625_v38 = vrot.slane %v288_v36, 1  ;;  %v635_v39 = vperm.slane %v288_v36, 0  ;;  %292 = vrot.lane.b32.xlu0 %v288_v36, %s923_s23 }
 0x6f6   :  { %v636_v42 = vperm.slane %v625_v38, 0  ;;  %v663_v43 = vsel %vm662_vm15, %v660_v41, %v635_v39 }
 0x6f8   :  { %v664_v46 = vsel %vm662_vm15, %v661_v45, %v636_v42  ;;  %vm671_vm15 = vcmask 1044480  }
 0x766   :  { %v293_v47 = vpop.permute.xlu0 %292 }
 0x767   :  { %822 = vmatmul.msk.f32.vlgmr.msra.gmra.mxu3 %vm16_vm0, %v293_v47 }
 0x7ea   :  { %v313_v49 = vpop.f32.mrf.mxu3 }
 0x7eb   :  { %v316_v50 = vadd.f32 %v313_v49, %v290_v48  ;;  %v420_v48 = vld [vmem:[#allocation2 + $0x5] ss:$8 sm:$0x3] }
 0x7ed   :  { %871 = vtanh.f32 %v316_v50  ;;  %v823_v52 = vmul.f32 -1.442695, %v316_v50 }
 0x7ef   :  { %873 = vpow2.f32 %v823_v52 }
 0x7f3   :  { %v872_v51 = vpop.eup %871 }
 0x7f4   :  { %339 = vrot.lane.b32.xlu1 %v872_v51, %s922_s0 }
 0x7f5   :  { %v874_v53 = vpop.eup %873 }
 0x7f6   :  { %v320_v54 = vadd.f32 1.0, %v874_v53 }
 0x7f8   :  { %875 = vrcp.f32 %v320_v54  ;;  %v332_v59 = vand.u32 2147483648, %v320_v54  ;;  %vm326_vm2 = vweird.f32 %v320_v54  ;;  %v330_v60 = vand.u32 2147483647, %v320_v54 }
 0x7fa   :  { %v333_v62 = vor.u32 1.1754944e-38, %v332_v59  ;;  %vm331_vm4 = vcmp.eq.f32.partialorder %v330_v60, 8.507059e+37 }
 0x7fe   :  { %v876_v44 = vpop.eup %875 }
 0x7ff   :  { %v322_v55 = vmul.f32 %v876_v44, %v320_v54  ;;  %vm327_vm1 = vweird.f32 %v876_v44 }
 0x800   :  { %vm328_vm3 = vmor %vm326_vm2, %vm327_vm1 }
 0x801   :  { %v323_v56 = vsub.f32 1.0, %v322_v55 }
 0x803   :  { %v324_v57 = vmul.f32 %v876_v44, %v323_v56 }
 0x805   :  { %v325_v58 = vadd.f32 %v876_v44, %v324_v57 }
 0x807   :  { %v329_v61 = vsel %vm328_vm3, %v876_v44, %v325_v58 }
 0x808   :  { %v334_v2 = vsel %vm331_vm4, %v333_v62, %v329_v61 }
 0x809   :  { %v337_v4 = vmul.f32 %v334_v2, %v282_v31 }
 0x866   :  { %v340_v63 = vpop.permute.xlu1 %339 }
 0x867   :  { %v342_v3 = vmul.f32 %v340_v63, %v334_v2 }
 0x869   :  { %344 = vrot.lane.b32.xlu2 %v342_v3, %s921_s20 }
 0x8c3   :  { %v345_v5 = vpop.permute.xlu2 %344 }
 0x8c4   :  { %v347_v6 = vadd.f32 %v345_v5, %v337_v4 }
 0x8c6   :  { %877 = vtanh.f32 %v347_v6 }
 0x8cc   :  { %v878_v7 = vpop.eup %877 }
 0x8cd   :  { %350 = vrot.lane.b32.xlu0 %v878_v7, %s921_s20 }
 0x93f   :  { %v351_v8 = vpop.permute.xlu0 %350 }
 0x940   :  { %v353_v9 = vmul.f32 %v351_v8, %v334_v2 }
 0x942   :  { %v626_v10 = vrot.slane %v353_v9, 1  ;;  %v639_v11 = vperm.slane %v353_v9, 0  ;;  %357 = vrot.lane.b32.xlu1 %v353_v9, %s923_s23 }
 0x944   :  { %v640_v12 = vperm.slane %v626_v10, 0  ;;  %v666_v13 = vsel %vm665_vm5, %v663_v43, %v639_v11 }
 0x946   :  { %v667_v14 = vsel %vm665_vm5, %v664_v46, %v640_v12  ;;  %vm674_vm5 = vcmask 1045504  }
 0x9b4   :  { %v358_v15 = vpop.permute.xlu1 %357 }
 0x9b5   :  { %824 = vmatmul.msk.f32.vlgmr.msrb.gmra.mxu0 %vm16_vm0, %v358_v15 }
 0xa32   :  { %v378_v17 = vpop.f32.mrf.mxu0 }
 0xa33   :  { %v381_v18 = vadd.f32 %v378_v17, %v355_v16  ;;  %v485_v16 = vld [vmem:[#allocation2 + $0x6] ss:$8 sm:$0x3] }
 0xa35   :  { %879 = vtanh.f32 %v381_v18  ;;  %v825_v20 = vmul.f32 -1.442695, %v381_v18 }
 0xa37   :  { %881 = vpow2.f32 %v825_v20 }
 0xa3b   :  { %v880_v19 = vpop.eup %879 }
 0xa3c   :  { %404 = vrot.lane.b32.xlu2 %v880_v19, %s922_s0 }
 0xa3d   :  { %v882_v21 = vpop.eup %881 }
 0xa3e   :  { %v385_v22 = vadd.f32 1.0, %v882_v21 }
 0xa40   :  { %883 = vrcp.f32 %v385_v22  ;;  %v397_v28 = vand.u32 2147483648, %v385_v22  ;;  %vm391_vm7 = vweird.f32 %v385_v22  ;;  %v395_v29 = vand.u32 2147483647, %v385_v22 }
 0xa42   :  { %v398_v31 = vor.u32 1.1754944e-38, %v397_v28  ;;  %vm396_vm9 = vcmp.eq.f32.partialorder %v395_v29, 8.507059e+37 }
 0xa46   :  { %v884_v23 = vpop.eup %883 }
 0xa47   :  { %v387_v24 = vmul.f32 %v884_v23, %v385_v22  ;;  %vm392_vm6 = vweird.f32 %v884_v23 }
 0xa48   :  { %vm393_vm8 = vmor %vm391_vm7, %vm392_vm6 }
 0xa49   :  { %v388_v25 = vsub.f32 1.0, %v387_v24 }
 0xa4b   :  { %v389_v26 = vmul.f32 %v884_v23, %v388_v25 }
 0xa4d   :  { %v390_v27 = vadd.f32 %v884_v23, %v389_v26 }
 0xa4f   :  { %v394_v30 = vsel %vm393_vm8, %v884_v23, %v390_v27 }
 0xa50   :  { %v399_v33 = vsel %vm396_vm9, %v398_v31, %v394_v30 }
 0xa51   :  { %v402_v35 = vmul.f32 %v399_v33, %v347_v6 }
 0xa96   :  { %v405_v32 = vpop.permute.xlu2 %404 }
 0xa97   :  { %v407_v34 = vmul.f32 %v405_v32, %v399_v33 }
 0xa99   :  { %409 = vrot.lane.b32.xlu0 %v407_v34, %s921_s20 }
 0xb0b   :  { %v410_v36 = vpop.permute.xlu0 %409 }
 0xb0c   :  { %v412_v37 = vadd.f32 %v410_v36, %v402_v35 }
 0xb0e   :  { %885 = vtanh.f32 %v412_v37 }
 0xb14   :  { %v886_v38 = vpop.eup %885 }
 0xb15   :  { %415 = vrot.lane.b32.xlu1 %v886_v38, %s921_s20 }
 0xb87   :  { %v416_v39 = vpop.permute.xlu1 %415 }
 0xb88   :  { %v418_v40 = vmul.f32 %v416_v39, %v399_v33 }
 0xb8a   :  { %v627_v41 = vrot.slane %v418_v40, 1  ;;  %v643_v42 = vperm.slane %v418_v40, 0  ;;  %422 = vrot.lane.b32.xlu2 %v418_v40, %s923_s23 }
 0xb8c   :  { %v644_v43 = vperm.slane %v627_v41, 0  ;;  %v669_v45 = vsel %vm668_vm10, %v666_v13, %v643_v42 }
 0xb8e   :  { %v670_v46 = vsel %vm668_vm10, %v667_v14, %v644_v43  ;;  %vm677_vm10 = vcmask 1046528  }
 0xbe4   :  { %v423_v47 = vpop.permute.xlu2 %422 }
 0xbe5   :  { %826 = vmatmul.msk.f32.vlgmr.msrb.gmra.mxu1 %vm16_vm0, %v423_v47 }
 0xc62   :  { %v443_v49 = vpop.f32.mrf.mxu1 }
 0xc63   :  { %v446_v50 = vadd.f32 %v443_v49, %v420_v48  ;;  %v550_v48 = vld [vmem:[#allocation2 + $0x7] ss:$8 sm:$0x3] }
 0xc65   :  { %887 = vtanh.f32 %v446_v50  ;;  %v827_v52 = vmul.f32 -1.442695, %v446_v50 }
 0xc67   :  { %889 = vpow2.f32 %v827_v52 }
 0xc6b   :  { %v888_v51 = vpop.eup %887 }
 0xc6c   :  { %469 = vrot.lane.b32.xlu0 %v888_v51, %s922_s0 }
 0xc6d   :  { %v890_v53 = vpop.eup %889 }
 0xc6e   :  { %v450_v54 = vadd.f32 1.0, %v890_v53 }
 0xc70   :  { %891 = vrcp.f32 %v450_v54  ;;  %v462_v59 = vand.u32 2147483648, %v450_v54  ;;  %vm456_vm12 = vweird.f32 %v450_v54  ;;  %v460_v60 = vand.u32 2147483647, %v450_v54 }
 0xc72   :  { %v463_v62 = vor.u32 1.1754944e-38, %v462_v59  ;;  %vm461_vm14 = vcmp.eq.f32.partialorder %v460_v60, 8.507059e+37 }
 0xc76   :  { %v892_v44 = vpop.eup %891 }
 0xc77   :  { %v452_v55 = vmul.f32 %v892_v44, %v450_v54  ;;  %vm457_vm11 = vweird.f32 %v892_v44 }
 0xc78   :  { %vm458_vm13 = vmor %vm456_vm12, %vm457_vm11 }
 0xc79   :  { %v453_v56 = vsub.f32 1.0, %v452_v55 }
 0xc7b   :  { %v454_v57 = vmul.f32 %v892_v44, %v453_v56 }
 0xc7d   :  { %v455_v58 = vadd.f32 %v892_v44, %v454_v57 }
 0xc7f   :  { %v459_v61 = vsel %vm458_vm13, %v892_v44, %v455_v58  ;;  %vm618_vm13 = vcmask 58368  }
 0xc80   :  { %v464_v2 = vsel %vm461_vm14, %v463_v62, %v459_v61 }
 0xc81   :  { %v467_v4 = vmul.f32 %v464_v2, %v412_v37 }
 0xcde   :  { %v470_v63 = vpop.permute.xlu0 %469 }
 0xcdf   :  { %v472_v3 = vmul.f32 %v470_v63, %v464_v2 }
 0xce1   :  { %474 = vrot.lane.b32.xlu1 %v472_v3, %s921_s20 }
 0xd53   :  { %v475_v5 = vpop.permute.xlu1 %474 }
 0xd54   :  { %v477_v6 = vadd.f32 %v475_v5, %v467_v4 }
 0xd56   :  { %893 = vtanh.f32 %v477_v6 }
 0xd5c   :  { %v894_v7 = vpop.eup %893 }
 0xd5d   :  { %480 = vrot.lane.b32.xlu2 %v894_v7, %s921_s20 }
 0xdb7   :  { %v481_v8 = vpop.permute.xlu2 %480 }
 0xdb8   :  { %v483_v9 = vmul.f32 %v481_v8, %v464_v2 }
 0xdba   :  { %v628_v10 = vrot.slane %v483_v9, 1  ;;  %v647_v11 = vperm.slane %v483_v9, 0  ;;  %487 = vrot.lane.b32.xlu0 %v483_v9, %s923_s23 }
 0xdbc   :  { %v648_v12 = vperm.slane %v628_v10, 0  ;;  %v672_v13 = vsel %vm671_vm15, %v669_v45, %v647_v11 }
 0xdbe   :  { %v673_v14 = vsel %vm671_vm15, %v670_v46, %v648_v12  ;;  %vm620_vm15 = vcmask 123968  }
 0xe2c   :  { %v488_v15 = vpop.permute.xlu0 %487 }
 0xe2d   :  { %828 = vmatmul.msk.f32.vlgmr.msrb.gmra.mxu2 %vm16_vm0, %v488_v15 }
 0xeb0   :  { %v508_v17 = vpop.f32.mrf.mxu2 }
 0xeb1   :  { %v511_v18 = vadd.f32 %v508_v17, %v485_v16 }
 0xeb3   :  { %895 = vtanh.f32 %v511_v18  ;;  %v829_v20 = vmul.f32 -1.442695, %v511_v18 }
 0xeb5   :  { %897 = vpow2.f32 %v829_v20 }
 0xeb9   :  { %v896_v19 = vpop.eup %895 }
 0xeba   :  { %534 = vrot.lane.b32.xlu1 %v896_v19, %s922_s0 }
 0xebb   :  { %v898_v21 = vpop.eup %897 }
 0xebc   :  { %v515_v22 = vadd.f32 1.0, %v898_v21 }
 0xebe   :  { %899 = vrcp.f32 %v515_v22  ;;  %v527_v28 = vand.u32 2147483648, %v515_v22  ;;  %vm521_vm2 = vweird.f32 %v515_v22  ;;  %v525_v29 = vand.u32 2147483647, %v515_v22 }
 0xec0   :  { %v528_v31 = vor.u32 1.1754944e-38, %v527_v28  ;;  %vm526_vm4 = vcmp.eq.f32.partialorder %v525_v29, 8.507059e+37 }
 0xec4   :  { %v900_v23 = vpop.eup %899 }
 0xec5   :  { %v517_v24 = vmul.f32 %v900_v23, %v515_v22  ;;  %vm522_vm1 = vweird.f32 %v900_v23 }
 0xec6   :  { %vm523_vm3 = vmor %vm521_vm2, %vm522_vm1 }
 0xec7   :  { %v518_v25 = vsub.f32 1.0, %v517_v24 }
 0xec9   :  { %v519_v26 = vmul.f32 %v900_v23, %v518_v25 }
 0xecb   :  { %v520_v27 = vadd.f32 %v900_v23, %v519_v26 }
 0xecd   :  { %v524_v30 = vsel %vm523_vm3, %v900_v23, %v520_v27 }
 0xece   :  { %v529_v33 = vsel %vm526_vm4, %v528_v31, %v524_v30 }
 0xecf   :  { %v532_v35 = vmul.f32 %v529_v33, %v477_v6 }
 0xf2c   :  { %v535_v32 = vpop.permute.xlu1 %534 }
 0xf2d   :  { %v537_v34 = vmul.f32 %v535_v32, %v529_v33 }
 0xf2f   :  { %539 = vrot.lane.b32.xlu2 %v537_v34, %s921_s20 }
 0xf89   :  { %v540_v36 = vpop.permute.xlu2 %539 }
 0xf8a   :  { %v542_v37 = vadd.f32 %v540_v36, %v532_v35 }
 0xf8c   :  { %901 = vtanh.f32 %v542_v37 }
 0xf92   :  { %v902_v38 = vpop.eup %901 }
 0xf93   :  { %545 = vrot.lane.b32.xlu0 %v902_v38, %s921_s20 }
0x1005   :  { %v546_v39 = vpop.permute.xlu0 %545 }
0x1006   :  { %v548_v40 = vmul.f32 %v546_v39, %v529_v33 }
0x1008   :  { %v629_v41 = vrot.slane %v548_v40, 1  ;;  %v651_v42 = vperm.slane %v548_v40, 0  ;;  %552 = vrot.lane.b32.xlu1 %v548_v40, %s923_s23 }
0x100a   :  { %v652_v43 = vperm.slane %v629_v41, 0  ;;  %v675_v45 = vsel %vm674_vm5, %v672_v13, %v651_v42 }
0x100c   :  { %v676_v46 = vsel %vm674_vm5, %v673_v14, %v652_v43 }
0x107a   :  { %v553_v47 = vpop.permute.xlu1 %552 }
0x107b   :  { %830 = vmatmul.msk.f32.vlgmr.msrb.gmra.mxu3 %vm16_vm0, %v553_v47 }
0x10fe   :  { %v573_v49 = vpop.f32.mrf.mxu3 }
0x10ff   :  { %v576_v50 = vadd.f32 %v573_v49, %v550_v48 }
0x1101   :  { %903 = vtanh.f32 %v576_v50  ;;  %v831_v52 = vmul.f32 -1.442695, %v576_v50 }
0x1103   :  { %905 = vpow2.f32 %v831_v52 }
0x1107   :  { %v904_v51 = vpop.eup %903 }
0x1108   :  { %599 = vrot.lane.b32.xlu2 %v904_v51, %s922_s0 }
0x1109   :  { %v906_v53 = vpop.eup %905 }
0x110a   :  { %v580_v54 = vadd.f32 1.0, %v906_v53 }
0x110c   :  { %907 = vrcp.f32 %v580_v54  ;;  %v592_v59 = vand.u32 2147483648, %v580_v54  ;;  %vm586_vm7 = vweird.f32 %v580_v54  ;;  %v590_v60 = vand.u32 2147483647, %v580_v54 }
0x110e   :  { %v593_v62 = vor.u32 1.1754944e-38, %v592_v59  ;;  %vm591_vm9 = vcmp.eq.f32.partialorder %v590_v60, 8.507059e+37 }
0x1110   :  { %688 = vrot.lane.b32.xlu2 %v945_v0, %s924_s24 }
0x1112   :  { %v908_v44 = vpop.eup %907 }
0x1113   :  { %v582_v55 = vmul.f32 %v908_v44, %v580_v54  ;;  %vm587_vm6 = vweird.f32 %v908_v44 }
0x1114   :  { %vm588_vm8 = vmor %vm586_vm7, %vm587_vm6 }
0x1115   :  { %v583_v56 = vsub.f32 1.0, %v582_v55 }
0x1117   :  { %v584_v57 = vmul.f32 %v908_v44, %v583_v56 }
0x1118   :  { %691 = vrot.lane.b32.xlu2 %v950_v1, %s920_s1 }
0x1119   :  { %v585_v58 = vadd.f32 %v908_v44, %v584_v57 }
0x111b   :  { %v589_v61 = vsel %vm588_vm8, %v908_v44, %v585_v58 }
0x111c   :  { %v594_v2 = vsel %vm591_vm9, %v593_v62, %v589_v61 }
0x111d   :  { %v597_v4 = vmul.f32 %v594_v2, %v542_v37 }
0x1162   :  { %v600_v63 = vpop.permute.xlu2 %599 }
0x1163   :  { %v602_v3 = vmul.f32 %v600_v63, %v594_v2 }
0x1165   :  { %604 = vrot.lane.b32.xlu0 %v602_v3, %s921_s20 }
0x116a   :  { %v689_v8 = vpop.permute.xlu2 %688 }
0x116b   :  { %713 = vmatpush.msra.mxu0 %v689_v8 }
0x1172   :  { %v692_v21 = vpop.permute.xlu2 %691 }
0x11d7   :  { %v605_v5 = vpop.permute.xlu0 %604 }
0x11d8   :  { %v1030_v6 = vadd.f32 %v605_v5, %v597_v4 }
0x11da   :  { %909 = vtanh.f32 %v1030_v6 }
0x11e0   :  { %v910_v7 = vpop.eup %909 }
0x11e1   :  { %610 = vrot.lane.b32.xlu1 %v910_v7, %s921_s20 }
0x1253   :  { %v611_v9 = vpop.permute.xlu1 %610 }
0x1254   :  { %v613_v10 = vmul.f32 %v611_v9, %v594_v2 }
0x1256   :  { %v630_v11 = vrot.slane %v613_v10, 1  ;;  %v655_v12 = vperm.slane %v613_v10, 0 }
0x1258   :  { %v656_v13 = vperm.slane %v630_v11, 0  ;;  %v678_v14 = vsel %vm677_vm10, %v675_v45, %v655_v12 }
0x1259   :  { %v680_v15 = vmax.f32 %v678_v14, 0.0 }
0x125a   :  { %v679_v16 = vsel %vm677_vm10, %v676_v46, %v656_v13 }
0x125b   :  { %684 = vrot.lane.b32.xlu0 %v680_v15, %s923_s23  ;;  %v681_v17 = vmax.f32 %v679_v16, 0.0 }
0x125d   :  { %686 = vrot.lane.b32.xlu1 %v681_v17, %s923_s23 }
0x1263   :  { %723 = vrot.lane.b32.xlu0 %v945_v0, %s925_s25 }
0x1265   :  { %726 = vrot.lane.b32.xlu1 %v950_v1, %s926_s26 }
0x12cd   :  { %v685_v18 = vpop.permute.xlu0 %684 }
0x12ce   :  { %832 = vmatmul.msk.f32.vlgmr.msra.gmra.mxu0 %vm16_vm0, %v685_v18 }
0x12cf   :  { %v687_v19 = vpop.permute.xlu1 %686 }
0x12d5   :  { %v724_v20 = vpop.permute.xlu0 %723 }
0x12d6   :  { %833 = vmatmul.msk.f32.gmra.mxu0 %vm16_vm0, %v687_v19  ;;  %750 = vmatpush.msra.mxu1 %v724_v20 }
0x12d7   :  { %v727_v27 = vpop.permute.xlu1 %726 }
0x134b   :  { %v715_v22 = vpop.f32.mrf.mxu0 }
0x134c   :  { %v716_v23 = vadd.f32 %v715_v22, %v692_v21 }
0x134e   :  { %v721_v24 = vmax.f32 %v716_v23, 0.0 }
0x1350   :  { %834 = vmatmul.msk.f32.vlgmr.msra.gmra.mxu1 %vm16_vm0, %v721_v24 }
0x1353   :  { %v718_v25 = vpop.f32.mrf.mxu0 }
0x1354   :  { %v719_v26 = vadd.f32 %v718_v25, %v692_v21 }
0x1356   :  { %v722_v0 = vmax.f32 %v719_v26, 0.0 }
0x1358   :  { %835 = vmatmul.msk.f32.gmra.mxu1 %vm16_vm0, %v722_v0 }
0x13cd   :  { %v752_v28 = vpop.f32.mrf.mxu1 }
0x13ce   :  { %v753_v29 = vadd.f32 %v752_v28, %v727_v27 }
0x13d0   :  { %v758_v30 = vsel %vm16_vm0, %v753_v29, -inf }
0x13d1   :  { %759 = vmax.xlane.f32.xlu2 %v758_v30 }
0x13d5   :  { %v755_v31 = vpop.f32.mrf.mxu1 }
0x13d6   :  { %v756_v32 = vadd.f32 %v755_v31, %v727_v27 }
0x13d8   :  { %v761_v1 = vsel %vm16_vm0, %v756_v32, -inf }
0x13d9   :  { %762 = vmax.xlane.f32.xlu0 %v761_v1 }
0x1444   :  { %v760_v33 = vpop.xlane.xlu2 %759 }
0x1445   :  { %v764_v34 = vsub.f32 %v753_v29, %v760_v33 }
0x1447   :  { %v766_v35 = vmul.f32 1.442695, %v764_v34 }
0x1449   :  { %911 = vpow2.f32 %v766_v35 }
0x144c   :  { %v763_v36 = vpop.xlane.xlu0 %762 }
0x144d   :  { %v765_v37 = vsub.f32 %v756_v32, %v763_v36 }
0x144f   :  { %v912_v38 = vpop.eup %911  ;;  %v768_v39 = vmul.f32 1.442695, %v765_v37 }
0x1450   :  { %v770_v40 = vsel %vm16_vm0, %v912_v38, 0.0 }
0x1451   :  { %913 = vpow2.f32 %v768_v39  ;;  %771 = vadd.xlane.f32.xlu1 %v770_v40 }
0x1457   :  { %v914_v41 = vpop.eup %913 }
0x1458   :  { %v773_v42 = vsel %vm16_vm0, %v914_v41, 0.0 }
0x1459   :  { %774 = vadd.xlane.f32.xlu2 %v773_v42 }
0x1471   :  { %615 = vrot.lane.b32.xlu2 %v613_v10, %s923_s23 }
0x14c4   :  { %v772_v43 = vpop.xlane.xlu1 %771 }
0x14c5   :  { %915 = vrcp.f32 %v772_v43  ;;  %v787_v49 = vand.u32 2147483648, %v772_v43  ;;  %v785_v51 = vand.u32 2147483647, %v772_v43  ;;  %vm781_vm12 = vweird.f32 %v772_v43 }
0x14c7   :  { %v788_v54 = vor.u32 1.1754944e-38, %v787_v49  ;;  %vm786_vm1 = vcmp.eq.f32.partialorder %v785_v51, 8.507059e+37 }
0x14cb   :  { %v916_v45 = vpop.eup %915 }
0x14cc   :  { %v777_v46 = vmul.f32 %v916_v45, %v772_v43  ;;  %v775_v47 = vpop.xlane.xlu2 %774  ;;  %vm782_vm11 = vweird.f32 %v916_v45 }
0x14cd   :  { %917 = vrcp.f32 %v775_v47  ;;  %vm783_vm14 = vmor %vm781_vm12, %vm782_vm11  ;;  %v801_v60 = vand.u32 2147483648, %v775_v47  ;;  %v799_v62 = vand.u32 2147483647, %v775_v47  ;;  %vm795_vm3 = vweird.f32 %v775_v47 }
0x14ce   :  { %v778_v48 = vsub.f32 1.0, %v777_v46 }
0x14cf   :  { %v802_v2 = vor.u32 1.1754944e-38, %v801_v60  ;;  %vm800_vm5 = vcmp.eq.f32.partialorder %v799_v62, 8.507059e+37 }
0x14d0   :  { %v779_v50 = vmul.f32 %v916_v45, %v778_v48 }
0x14d2   :  { %v780_v52 = vadd.f32 %v916_v45, %v779_v50 }
0x14d3   :  { %v918_v53 = vpop.eup %917 }
0x14d4   :  { %v784_v44 = vsel %vm783_vm14, %v916_v45, %v780_v52  ;;  %v791_v55 = vmul.f32 %v918_v53, %v775_v47  ;;  %v616_v56 = vpop.permute.xlu2 %615  ;;  %vm796_vm2 = vweird.f32 %v918_v53 }
0x14d5   :  { %v789_v57 = vsel %vm786_vm1, %v788_v54, %v784_v44  ;;  %619 = vst.msk [vmem:[%s1067_s2 + $0x10] sm:$0x3] %vm618_vm13, %v616_v56  ;;  %vm797_vm4 = vmor %vm795_vm3, %vm796_vm2 }
0x14d6   :  { %v804_v58 = vmul.f32 %v912_v38, %v789_v57  ;;  %v792_v59 = vsub.f32 1.0, %v791_v55  ;;  %621 = vst.msk [vmem:[%s1067_s2 + $0x10] sm:$0x3] %vm620_vm15, %v1030_v6 }
0x14d8   :  { %v793_v61 = vmul.f32 %v918_v53, %v792_v59  ;;  %806 = vst.msk [vmem:[%s1067_s2] sm:$0xff] %vm16_vm0, %v804_v58 }
0x14da   :  { %v794_v63 = vadd.f32 %v918_v53, %v793_v61 }
0x14dc   :  { %v798_v3 = vsel %vm797_vm4, %v918_v53, %v794_v63 }
0x14dd   :  { %v803_v4 = vsel %vm800_vm5, %v802_v2, %v798_v3 }
0x14de   :  { %v805_v5 = vmul.f32 %v914_v41, %v803_v4 }
0x14e0   :  { %807 = vst.msk [vmem:[%s1067_s2 + $0x8] sm:$0xff] %vm16_vm0, %v805_v5 }

</bundles_post_ra>
